<compile_context>
chip_gen: v7x
topology: tpu7x:2x2x1
jax: 0.10.0
libtpu: 0.0.40
codegen_flags: <defaults>
</compile_context>

<pallas_src>
import functools

import jax
import jax.numpy as jnp
from jax.experimental import pallas as pl
from jax.experimental.pallas import tpu as pltpu


# ----------------------------- config ---------------------------------------
CONFIG = dict(
    embsize=32,
    drate=0.0,          # dropout is not applied in forward() -> no-op
    kernel_size=3,      # unused by forward()
    kernel_num=11,
    sigma=0.1,
    exact_sigma=0.001,
    out_size=1,
)
VOCAB_SIZE = 100


def _make_mus_sigmas(kernel_num, sigma, exact_sigma):
    """Replicates the per-kernel mu/sigma schedule from KNRM.forward."""
    mus, sigmas = [], []
    for i in range(kernel_num):
        mu = 1.0 / (kernel_num - 1) + 2.0 * i / (kernel_num - 1) - 1.0
        sig = sigma
        if mu > 1.0:
            sig = exact_sigma
            mu = 1.0
        mus.append(mu)
        sigmas.append(sig)
    return tuple(mus), tuple(sigmas)


# ----------------------------- kernel ----------------------------------------
def _knrm_kernel(q_ref, d_ref, phi_ref, *, mus, sigmas):
    """One block of Bt batch elements per grid step.

    q_ref:   (Bt, Lq, E) f32
    d_ref:   (Bt, Ld, E) f32
    phi_ref: (Bt, K)     f32   -- per-kernel pooled features (Phi)
    """
    q = q_ref[...]          # (Bt, Lq, E)
    d = d_ref[...]          # (Bt, Ld, E)

    # Raw Gram matrix on the MXU: contract E directly (no transpose of d).
    raw = jnp.einsum('bqe,bde->bqd', q, d,
                     preferred_element_type=jnp.float32)        # (Bt, Lq, Ld)

    # F.normalize(p=2, dim=-1) on both operands, folded in AFTER the matmul:
    #   sim = (q . d) / (max(||q||, 1e-12) * max(||d||, 1e-12))
    # rsqrt(max(sumsq, 1e-24)) == 1 / max(sqrt(sumsq), 1e-12) and runs on the
    # (otherwise idle) EUP slot instead of a VPU divide chain.
    q_inv = jax.lax.rsqrt(
        jnp.maximum(jnp.sum(q * q, axis=-1, keepdims=True), 1e-24))   # (Bt, Lq, 1)
    d_inv = jax.lax.rsqrt(
        jnp.maximum(jnp.sum(d * d, axis=-1), 1e-24))                  # (Bt, Ld)
    sim = raw * q_inv * d_inv[:, None, :]                             # (Bt, Lq, Ld)

    # RBF kernel pooling (kernel_num is small -> static unroll).
    # NOTE: keep (sim - mu)^2 form; the expanded quadratic form cancels
    # catastrophically for the exact-match kernel (sigma = 1e-3).
    for i, (mu, sg) in enumerate(zip(mus, sigmas)):
        t = sim - mu
        mm_exp = jnp.exp(t * t * (-0.5 / (sg * sg)))        # (Bt, Lq, Ld) EUP
        mm_doc_sum = jnp.sum(mm_exp, axis=2)                # (Bt, Lq)  lane reduce
        mm_log = jnp.log1p(mm_doc_sum)                      # (Bt, Lq)
        phi_ref[:, i:i + 1] = jnp.sum(mm_log, axis=1, keepdims=True)   # (Bt, 1)


# ----------------------------- wrapper ----------------------------------------
def knrm_forward(query_batch, doc_batch, emb_table, score_w, score_b, config,
                 *, bt_max=256):
    """query_batch: (B, Lq) int32, doc_batch: (B, Ld) int32 -> (B, 1) f32."""
    B, Lq = query_batch.shape
    doc_batch = doc_batch.reshape(B, -1)          # doc_batch.view(batch_size, -1)
    Ld = doc_batch.shape[1]
    E = config['embsize']
    K = config['kernel_num']

    # Embedding lookup (plain-JAX gather glue).
    # TODO(synk): at large B, fold this gather into the kernel (scalar-prefetch
    # token ids + in-kernel gather/DMA from the HBM table) to halve HBM traffic.
    q_emb = emb_table[query_batch].astype(jnp.float32)   # (B, Lq, E)
    d_emb = emb_table[doc_batch].astype(jnp.float32)     # (B, Ld, E)

    # Batch-block size: as large as possible to amortise per-step overhead, but
    # keep >= 2 grid steps when B is big enough so the "parallel" batch axis
    # shards across v7x's two TensorCores.
    bt = min(B, bt_max)
    if B >= 16 and pl.cdiv(B, bt) < 2:
        bt = min(B, ((pl.cdiv(B, 2) + 7) // 8) * 8)   # keep 2nd-minor dim 8-aligned
    grid_b = pl.cdiv(B, bt)

    mus, sigmas = _make_mus_sigmas(K, config['sigma'], config['exact_sigma'])
    kernel = functools.partial(_knrm_kernel, mus=mus, sigmas=sigmas)

    cost = pl.CostEstimate(
        flops=2 * B * Lq * Ld * E + 6 * K * B * Lq * Ld,
        transcendentals=K * B * Lq * (Ld + 1) + B * (Lq + Ld),
        bytes_accessed=4 * (B * Lq * E + B * Ld * E + B * K),
    )

    phi = pl.pallas_call(
        kernel,
        out_shape=jax.ShapeDtypeStruct((B, K), jnp.float32),
        grid=(grid_b,),
        in_specs=[
            pl.BlockSpec((bt, Lq, E), lambda bi: (bi, 0, 0)),
            pl.BlockSpec((bt, Ld, E), lambda bi: (bi, 0, 0)),
        ],
        out_specs=pl.BlockSpec((bt, K), lambda bi: (bi, 0)),
        compiler_params=pltpu.CompilerParams(
            dimension_semantics=("parallel",)),
        cost_estimate=cost,
    )(q_emb, d_emb)

    # nn.Linear(kernel_num, 1): tiny, fused by XLA outside the kernel so the
    # Pallas output stays a lane-dense (Bt, K) slab per step.
    w = score_w.reshape(K, 1).astype(jnp.float32)
    b = score_b.reshape(1, 1).astype(jnp.float32)
    return phi @ w + b


# ----------------------------- reference (pure JAX) ---------------------------
def knrm_reference(query_batch, doc_batch, emb_table, score_w, score_b, config):
    B = query_batch.shape[0]
    doc_batch = doc_batch.reshape(B, -1)
    q_emb = emb_table[query_batch].astype(jnp.float32)
    d_emb = emb_table[doc_batch].astype(jnp.float32)
    qn = q_emb / jnp.maximum(
        jnp.linalg.norm(q_emb, axis=-1, keepdims=True), 1e-12)
    dn = d_emb / jnp.maximum(
        jnp.linalg.norm(d_emb, axis=-1, keepdims=True), 1e-12)
    sim = jnp.einsum('bqe,bde->bqd', qn, dn)
    mus, sigmas = _make_mus_sigmas(
        config['kernel_num'], config['sigma'], config['exact_sigma'])
    KM = []
    for mu, sg in zip(mus, sigmas):
        mm = jnp.exp(-0.5 * (sim - mu) ** 2 / (sg * sg))
        KM.append(jnp.sum(jnp.log1p(jnp.sum(mm, axis=2)), axis=1))
    Phi = jnp.stack(KM, axis=1)                               # (B, K)
    return Phi @ score_w.reshape(-1, 1) + score_b.reshape(1, 1)


# ----------------------------- main -------------------------------------------
if __name__ == "__main__":
    key = jax.random.PRNGKey(0)
    k_emb, k_w, k_b, k_q, k_d = jax.random.split(key, 5)

    B, Lq, Ld = 2, 8, 16
    E, K = CONFIG['embsize'], CONFIG['kernel_num']

    # Deterministic parameter init (synthetic, no checkpoint load).
    emb_table = jax.random.normal(k_emb, (VOCAB_SIZE, E), dtype=jnp.float32)
    score_w = jax.random.normal(k_w, (K,), dtype=jnp.float32) * 0.1
    score_b = jax.random.normal(k_b, (1,), dtype=jnp.float32) * 0.1

    query_batch = jax.random.randint(k_q, (B, Lq), 0, VOCAB_SIZE, dtype=jnp.int32)
    doc_batch = jax.random.randint(k_d, (B, Ld), 0, VOCAB_SIZE, dtype=jnp.int32)

    out = knrm_forward(query_batch, doc_batch, emb_table, score_w, score_b, CONFIG)
    out = jax.block_until_ready(out)

    ref = knrm_reference(query_batch, doc_batch, emb_table, score_w, score_b, CONFIG)
    assert out.shape == (B, 1)
    assert jnp.allclose(out, ref, rtol=1e-4, atol=1e-4), (out, ref)

    print("KERNEL_OK")
</pallas_src>

<mosaic_0001>
module attributes {stable_mosaic.version = 11 : i64} {
  func.func @_knrm_kernel(%arg0: i32, %arg1: memref<2x8x32xf32, #tpu.memory_space<vmem>>, %arg2: memref<2x16x32xf32, #tpu.memory_space<vmem>>, %arg3: memref<2x11xf32, #tpu.memory_space<vmem>>) attributes {dimension_semantics = [#tpu.dimension_semantics<parallel>], iteration_bounds = array<i64: 1>, scalar_prefetch = 0 : i64, scratch_operands = 0 : i64, tpu.core_type = #tpu.core_type<tc>, window_params = [{transform_indices = @transform_0, window_bounds = array<i64: 2, 8, 32>}, {transform_indices = @transform_1, window_bounds = array<i64: 2, 16, 32>}, {transform_indices = @transform_2, window_bounds = array<i64: 2, 11>}]} {
    %c0 = arith.constant 0 : index
    %c0_0 = arith.constant 0 : index
    %c0_1 = arith.constant 0 : index
    %0 = vector.load %arg1[%c0, %c0_0, %c0_1] : memref<2x8x32xf32, #tpu.memory_space<vmem>>, vector<2x8x32xf32>
    %c0_2 = arith.constant 0 : index
    %c0_3 = arith.constant 0 : index
    %c0_4 = arith.constant 0 : index
    %1 = vector.load %arg2[%c0_2, %c0_3, %c0_4] : memref<2x16x32xf32, #tpu.memory_space<vmem>>, vector<2x16x32xf32>
    "tpu.trace_start"() <{level = 10 : i32, message = "bqe,bde->bqd"}> : () -> ()
    %cst = arith.constant dense<0.000000e+00> : vector<2x8x16xf32>
    %2 = tpu.matmul %0, %1, %cst {dimension_numbers = #tpu.dot_dimension_numbers<[2], [2], [1], [1], [0, 0, 0, 1, 1, 1], [0], [0]>} : vector<2x8x32xf32>, vector<2x16x32xf32>, vector<2x8x16xf32> -> vector<2x8x16xf32>
    "tpu.trace_stop"() : () -> ()
    %3 = arith.mulf %0, %0 : vector<2x8x32xf32>
    %cst_5 = arith.constant dense<0.000000e+00> : vector<2x8xf32>
    %4 = vector.multi_reduction <add>, %3, %cst_5 [2] : vector<2x8x32xf32> to vector<2x8xf32>
    %5 = vector.shape_cast %4 : vector<2x8xf32> to vector<2x8x1xf32>
    %cst_6 = arith.constant 1.000000e-24 : f32
    %6 = vector.broadcast %cst_6 : f32 to vector<2x8x1xf32>
    %7 = arith.maximumf %5, %6 : vector<2x8x1xf32>
    %8 = math.rsqrt %7 : vector<2x8x1xf32>
    %9 = arith.mulf %1, %1 : vector<2x16x32xf32>
    %cst_7 = arith.constant dense<0.000000e+00> : vector<2x16xf32>
    %10 = vector.multi_reduction <add>, %9, %cst_7 [2] : vector<2x16x32xf32> to vector<2x16xf32>
    %cst_8 = arith.constant 1.000000e-24 : f32
    %11 = vector.broadcast %cst_8 : f32 to vector<2x16xf32>
    %12 = arith.maximumf %10, %11 : vector<2x16xf32>
    %13 = math.rsqrt %12 : vector<2x16xf32>
    %14 = vector.broadcast %8 : vector<2x8x1xf32> to vector<2x8x16xf32>
    %15 = arith.mulf %2, %14 : vector<2x8x16xf32>
    %16 = vector.shape_cast %13 : vector<2x16xf32> to vector<2x1x16xf32>
    %17 = vector.broadcast %16 : vector<2x1x16xf32> to vector<2x8x16xf32>
    %18 = arith.mulf %15, %17 : vector<2x8x16xf32>
    %cst_9 = arith.constant -0.899999976 : f32
    %19 = vector.broadcast %cst_9 : f32 to vector<2x8x16xf32>
    %20 = arith.subf %18, %19 : vector<2x8x16xf32>
    %21 = arith.mulf %20, %20 : vector<2x8x16xf32>
    %cst_10 = arith.constant -5.000000e+01 : f32
    %22 = vector.broadcast %cst_10 : f32 to vector<2x8x16xf32>
    %23 = arith.mulf %21, %22 : vector<2x8x16xf32>
    %24 = math.exp %23 : vector<2x8x16xf32>
    %cst_11 = arith.constant dense<0.000000e+00> : vector<2x8xf32>
    %25 = vector.multi_reduction <add>, %24, %cst_11 [2] : vector<2x8x16xf32> to vector<2x8xf32>
    %26 = math.log1p %25 : vector<2x8xf32>
    %cst_12 = arith.constant dense<0.000000e+00> : vector<2xf32>
    %27 = vector.multi_reduction <add>, %26, %cst_12 [1] : vector<2x8xf32> to vector<2xf32>
    %28 = vector.shape_cast %27 : vector<2xf32> to vector<2x1xf32>
    %c0_13 = arith.constant 0 : index
    %c0_14 = arith.constant 0 : index
    %29 = vector.load %arg3[%c0_13, %c0_14] : memref<2x11xf32, #tpu.memory_space<vmem>>, vector<2x1xf32>
    tpu.vector_store %arg3[%c0_13, %c0_14], %28 {strides = array<i32>} : memref<2x11xf32, #tpu.memory_space<vmem>>, vector<2x1xf32>,
    %cst_15 = arith.constant -0.699999988 : f32
    %30 = vector.broadcast %cst_15 : f32 to vector<2x8x16xf32>
    %31 = arith.subf %18, %30 : vector<2x8x16xf32>
    %32 = arith.mulf %31, %31 : vector<2x8x16xf32>
    %cst_16 = arith.constant -5.000000e+01 : f32
    %33 = vector.broadcast %cst_16 : f32 to vector<2x8x16xf32>
    %34 = arith.mulf %32, %33 : vector<2x8x16xf32>
    %35 = math.exp %34 : vector<2x8x16xf32>
    %cst_17 = arith.constant dense<0.000000e+00> : vector<2x8xf32>
    %36 = vector.multi_reduction <add>, %35, %cst_17 [2] : vector<2x8x16xf32> to vector<2x8xf32>
    %37 = math.log1p %36 : vector<2x8xf32>
    %cst_18 = arith.constant dense<0.000000e+00> : vector<2xf32>
    %38 = vector.multi_reduction <add>, %37, %cst_18 [1] : vector<2x8xf32> to vector<2xf32>
    %39 = vector.shape_cast %38 : vector<2xf32> to vector<2x1xf32>
    %c0_19 = arith.constant 0 : index
    %c1 = arith.constant 1 : index
    %40 = vector.load %arg3[%c0_19, %c1] : memref<2x11xf32, #tpu.memory_space<vmem>>, vector<2x1xf32>
    tpu.vector_store %arg3[%c0_19, %c1], %39 {strides = array<i32>} : memref<2x11xf32, #tpu.memory_space<vmem>>, vector<2x1xf32>,
    %cst_20 = arith.constant -5.000000e-01 : f32
    %41 = vector.broadcast %cst_20 : f32 to vector<2x8x16xf32>
    %42 = arith.subf %18, %41 : vector<2x8x16xf32>
    %43 = arith.mulf %42, %42 : vector<2x8x16xf32>
    %cst_21 = arith.constant -5.000000e+01 : f32
    %44 = vector.broadcast %cst_21 : f32 to vector<2x8x16xf32>
    %45 = arith.mulf %43, %44 : vector<2x8x16xf32>
    %46 = math.exp %45 : vector<2x8x16xf32>
    %cst_22 = arith.constant dense<0.000000e+00> : vector<2x8xf32>
    %47 = vector.multi_reduction <add>, %46, %cst_22 [2] : vector<2x8x16xf32> to vector<2x8xf32>
    %48 = math.log1p %47 : vector<2x8xf32>
    %cst_23 = arith.constant dense<0.000000e+00> : vector<2xf32>
    %49 = vector.multi_reduction <add>, %48, %cst_23 [1] : vector<2x8xf32> to vector<2xf32>
    %50 = vector.shape_cast %49 : vector<2xf32> to vector<2x1xf32>
    %c0_24 = arith.constant 0 : index
    %c2 = arith.constant 2 : index
    %51 = vector.load %arg3[%c0_24, %c2] : memref<2x11xf32, #tpu.memory_space<vmem>>, vector<2x1xf32>
    tpu.vector_store %arg3[%c0_24, %c2], %50 {strides = array<i32>} : memref<2x11xf32, #tpu.memory_space<vmem>>, vector<2x1xf32>,
    %cst_25 = arith.constant -3.000000e-01 : f32
    %52 = vector.broadcast %cst_25 : f32 to vector<2x8x16xf32>
    %53 = arith.subf %18, %52 : vector<2x8x16xf32>
    %54 = arith.mulf %53, %53 : vector<2x8x16xf32>
    %cst_26 = arith.constant -5.000000e+01 : f32
    %55 = vector.broadcast %cst_26 : f32 to vector<2x8x16xf32>
    %56 = arith.mulf %54, %55 : vector<2x8x16xf32>
    %57 = math.exp %56 : vector<2x8x16xf32>
    %cst_27 = arith.constant dense<0.000000e+00> : vector<2x8xf32>
    %58 = vector.multi_reduction <add>, %57, %cst_27 [2] : vector<2x8x16xf32> to vector<2x8xf32>
    %59 = math.log1p %58 : vector<2x8xf32>
    %cst_28 = arith.constant dense<0.000000e+00> : vector<2xf32>
    %60 = vector.multi_reduction <add>, %59, %cst_28 [1] : vector<2x8xf32> to vector<2xf32>
    %61 = vector.shape_cast %60 : vector<2xf32> to vector<2x1xf32>
    %c0_29 = arith.constant 0 : index
    %c3 = arith.constant 3 : index
    %62 = vector.load %arg3[%c0_29, %c3] : memref<2x11xf32, #tpu.memory_space<vmem>>, vector<2x1xf32>
    tpu.vector_store %arg3[%c0_29, %c3], %61 {strides = array<i32>} : memref<2x11xf32, #tpu.memory_space<vmem>>, vector<2x1xf32>,
    %cst_30 = arith.constant -1.000000e-01 : f32
    %63 = vector.broadcast %cst_30 : f32 to vector<2x8x16xf32>
    %64 = arith.subf %18, %63 : vector<2x8x16xf32>
    %65 = arith.mulf %64, %64 : vector<2x8x16xf32>
    %cst_31 = arith.constant -5.000000e+01 : f32
    %66 = vector.broadcast %cst_31 : f32 to vector<2x8x16xf32>
    %67 = arith.mulf %65, %66 : vector<2x8x16xf32>
    %68 = math.exp %67 : vector<2x8x16xf32>
    %cst_32 = arith.constant dense<0.000000e+00> : vector<2x8xf32>
    %69 = vector.multi_reduction <add>, %68, %cst_32 [2] : vector<2x8x16xf32> to vector<2x8xf32>
    %70 = math.log1p %69 : vector<2x8xf32>
    %cst_33 = arith.constant dense<0.000000e+00> : vector<2xf32>
    %71 = vector.multi_reduction <add>, %70, %cst_33 [1] : vector<2x8xf32> to vector<2xf32>
    %72 = vector.shape_cast %71 : vector<2xf32> to vector<2x1xf32>
    %c0_34 = arith.constant 0 : index
    %c4 = arith.constant 4 : index
    %73 = vector.load %arg3[%c0_34, %c4] : memref<2x11xf32, #tpu.memory_space<vmem>>, vector<2x1xf32>
    tpu.vector_store %arg3[%c0_34, %c4], %72 {strides = array<i32>} : memref<2x11xf32, #tpu.memory_space<vmem>>, vector<2x1xf32>,
    %cst_35 = arith.constant 1.000000e-01 : f32
    %74 = vector.broadcast %cst_35 : f32 to vector<2x8x16xf32>
    %75 = arith.subf %18, %74 : vector<2x8x16xf32>
    %76 = arith.mulf %75, %75 : vector<2x8x16xf32>
    %cst_36 = arith.constant -5.000000e+01 : f32
    %77 = vector.broadcast %cst_36 : f32 to vector<2x8x16xf32>
    %78 = arith.mulf %76, %77 : vector<2x8x16xf32>
    %79 = math.exp %78 : vector<2x8x16xf32>
    %cst_37 = arith.constant dense<0.000000e+00> : vector<2x8xf32>
    %80 = vector.multi_reduction <add>, %79, %cst_37 [2] : vector<2x8x16xf32> to vector<2x8xf32>
    %81 = math.log1p %80 : vector<2x8xf32>
    %cst_38 = arith.constant dense<0.000000e+00> : vector<2xf32>
    %82 = vector.multi_reduction <add>, %81, %cst_38 [1] : vector<2x8xf32> to vector<2xf32>
    %83 = vector.shape_cast %82 : vector<2xf32> to vector<2x1xf32>
    %c0_39 = arith.constant 0 : index
    %c5 = arith.constant 5 : index
    %84 = vector.load %arg3[%c0_39, %c5] : memref<2x11xf32, #tpu.memory_space<vmem>>, vector<2x1xf32>
    tpu.vector_store %arg3[%c0_39, %c5], %83 {strides = array<i32>} : memref<2x11xf32, #tpu.memory_space<vmem>>, vector<2x1xf32>,
    %cst_40 = arith.constant 3.000000e-01 : f32
    %85 = vector.broadcast %cst_40 : f32 to vector<2x8x16xf32>
    %86 = arith.subf %18, %85 : vector<2x8x16xf32>
    %87 = arith.mulf %86, %86 : vector<2x8x16xf32>
    %cst_41 = arith.constant -5.000000e+01 : f32
    %88 = vector.broadcast %cst_41 : f32 to vector<2x8x16xf32>
    %89 = arith.mulf %87, %88 : vector<2x8x16xf32>
    %90 = math.exp %89 : vector<2x8x16xf32>
    %cst_42 = arith.constant dense<0.000000e+00> : vector<2x8xf32>
    %91 = vector.multi_reduction <add>, %90, %cst_42 [2] : vector<2x8x16xf32> to vector<2x8xf32>
    %92 = math.log1p %91 : vector<2x8xf32>
    %cst_43 = arith.constant dense<0.000000e+00> : vector<2xf32>
    %93 = vector.multi_reduction <add>, %92, %cst_43 [1] : vector<2x8xf32> to vector<2xf32>
    %94 = vector.shape_cast %93 : vector<2xf32> to vector<2x1xf32>
    %c0_44 = arith.constant 0 : index
    %c6 = arith.constant 6 : index
    %95 = vector.load %arg3[%c0_44, %c6] : memref<2x11xf32, #tpu.memory_space<vmem>>, vector<2x1xf32>
    tpu.vector_store %arg3[%c0_44, %c6], %94 {strides = array<i32>} : memref<2x11xf32, #tpu.memory_space<vmem>>, vector<2x1xf32>,
    %cst_45 = arith.constant 5.000000e-01 : f32
    %96 = vector.broadcast %cst_45 : f32 to vector<2x8x16xf32>
    %97 = arith.subf %18, %96 : vector<2x8x16xf32>
    %98 = arith.mulf %97, %97 : vector<2x8x16xf32>
    %cst_46 = arith.constant -5.000000e+01 : f32
    %99 = vector.broadcast %cst_46 : f32 to vector<2x8x16xf32>
    %100 = arith.mulf %98, %99 : vector<2x8x16xf32>
    %101 = math.exp %100 : vector<2x8x16xf32>
    %cst_47 = arith.constant dense<0.000000e+00> : vector<2x8xf32>
    %102 = vector.multi_reduction <add>, %101, %cst_47 [2] : vector<2x8x16xf32> to vector<2x8xf32>
    %103 = math.log1p %102 : vector<2x8xf32>
    %cst_48 = arith.constant dense<0.000000e+00> : vector<2xf32>
    %104 = vector.multi_reduction <add>, %103, %cst_48 [1] : vector<2x8xf32> to vector<2xf32>
    %105 = vector.shape_cast %104 : vector<2xf32> to vector<2x1xf32>
    %c0_49 = arith.constant 0 : index
    %c7 = arith.constant 7 : index
    %106 = vector.load %arg3[%c0_49, %c7] : memref<2x11xf32, #tpu.memory_space<vmem>>, vector<2x1xf32>
    tpu.vector_store %arg3[%c0_49, %c7], %105 {strides = array<i32>} : memref<2x11xf32, #tpu.memory_space<vmem>>, vector<2x1xf32>,
    %cst_50 = arith.constant 0.699999988 : f32
    %107 = vector.broadcast %cst_50 : f32 to vector<2x8x16xf32>
    %108 = arith.subf %18, %107 : vector<2x8x16xf32>
    %109 = arith.mulf %108, %108 : vector<2x8x16xf32>
    %cst_51 = arith.constant -5.000000e+01 : f32
    %110 = vector.broadcast %cst_51 : f32 to vector<2x8x16xf32>
    %111 = arith.mulf %109, %110 : vector<2x8x16xf32>
    %112 = math.exp %111 : vector<2x8x16xf32>
    %cst_52 = arith.constant dense<0.000000e+00> : vector<2x8xf32>
    %113 = vector.multi_reduction <add>, %112, %cst_52 [2] : vector<2x8x16xf32> to vector<2x8xf32>
    %114 = math.log1p %113 : vector<2x8xf32>
    %cst_53 = arith.constant dense<0.000000e+00> : vector<2xf32>
    %115 = vector.multi_reduction <add>, %114, %cst_53 [1] : vector<2x8xf32> to vector<2xf32>
    %116 = vector.shape_cast %115 : vector<2xf32> to vector<2x1xf32>
    %c0_54 = arith.constant 0 : index
    %c8 = arith.constant 8 : index
    %117 = vector.load %arg3[%c0_54, %c8] : memref<2x11xf32, #tpu.memory_space<vmem>>, vector<2x1xf32>
    tpu.vector_store %arg3[%c0_54, %c8], %116 {strides = array<i32>} : memref<2x11xf32, #tpu.memory_space<vmem>>, vector<2x1xf32>,
    %cst_55 = arith.constant 0.899999976 : f32
    %118 = vector.broadcast %cst_55 : f32 to vector<2x8x16xf32>
    %119 = arith.subf %18, %118 : vector<2x8x16xf32>
    %120 = arith.mulf %119, %119 : vector<2x8x16xf32>
    %cst_56 = arith.constant -5.000000e+01 : f32
    %121 = vector.broadcast %cst_56 : f32 to vector<2x8x16xf32>
    %122 = arith.mulf %120, %121 : vector<2x8x16xf32>
    %123 = math.exp %122 : vector<2x8x16xf32>
    %cst_57 = arith.constant dense<0.000000e+00> : vector<2x8xf32>
    %124 = vector.multi_reduction <add>, %123, %cst_57 [2] : vector<2x8x16xf32> to vector<2x8xf32>
    %125 = math.log1p %124 : vector<2x8xf32>
    %cst_58 = arith.constant dense<0.000000e+00> : vector<2xf32>
    %126 = vector.multi_reduction <add>, %125, %cst_58 [1] : vector<2x8xf32> to vector<2xf32>
    %127 = vector.shape_cast %126 : vector<2xf32> to vector<2x1xf32>
    %c0_59 = arith.constant 0 : index
    %c9 = arith.constant 9 : index
    %128 = vector.load %arg3[%c0_59, %c9] : memref<2x11xf32, #tpu.memory_space<vmem>>, vector<2x1xf32>
    tpu.vector_store %arg3[%c0_59, %c9], %127 {strides = array<i32>} : memref<2x11xf32, #tpu.memory_space<vmem>>, vector<2x1xf32>,
    %cst_60 = arith.constant 1.000000e+00 : f32
    %129 = vector.broadcast %cst_60 : f32 to vector<2x8x16xf32>
    %130 = arith.subf %18, %129 : vector<2x8x16xf32>
    %131 = arith.mulf %130, %130 : vector<2x8x16xf32>
    %cst_61 = arith.constant -5.000000e+05 : f32
    %132 = vector.broadcast %cst_61 : f32 to vector<2x8x16xf32>
    %133 = arith.mulf %131, %132 : vector<2x8x16xf32>
    %134 = math.exp %133 : vector<2x8x16xf32>
    %cst_62 = arith.constant dense<0.000000e+00> : vector<2x8xf32>
    %135 = vector.multi_reduction <add>, %134, %cst_62 [2] : vector<2x8x16xf32> to vector<2x8xf32>
    %136 = math.log1p %135 : vector<2x8xf32>
    %cst_63 = arith.constant dense<0.000000e+00> : vector<2xf32>
    %137 = vector.multi_reduction <add>, %136, %cst_63 [1] : vector<2x8xf32> to vector<2xf32>
    %138 = vector.shape_cast %137 : vector<2xf32> to vector<2x1xf32>
    %c0_64 = arith.constant 0 : index
    %c10 = arith.constant 10 : index
    %139 = vector.load %arg3[%c0_64, %c10] : memref<2x11xf32, #tpu.memory_space<vmem>>, vector<2x1xf32>
    tpu.vector_store %arg3[%c0_64, %c10], %138 {strides = array<i32>} : memref<2x11xf32, #tpu.memory_space<vmem>>, vector<2x1xf32>,
    return
  }
  func.func @transform_0(%arg0: i32) -> (i32, i32, i32) {
    %c0_i32 = arith.constant 0 : i32
    %c0_i32_0 = arith.constant 0 : i32
    %c0_i32_1 = arith.constant 0 : i32
    return %arg0, %c0_i32, %c0_i32_0 : i32, i32, i32
  }
  func.func @transform_1(%arg0: i32) -> (i32, i32, i32) {
    %c0_i32 = arith.constant 0 : i32
    %c0_i32_0 = arith.constant 0 : i32
    %c0_i32_1 = arith.constant 0 : i32
    return %arg0, %c0_i32, %c0_i32_0 : i32, i32, i32
  }
  func.func @transform_2(%arg0: i32) -> (i32, i32) {
    %c0_i32 = arith.constant 0 : i32
    %c0_i32_0 = arith.constant 0 : i32
    return %arg0, %c0_i32 : i32, i32
  }
}

</mosaic_0001>

<bundles_post_ra>
// kernel: tpu_custom_call.1
= control target key start
LH: loop header
LB: loop body
LE: loop exit
PB: predicated region body
PF: predicated region fallthrough
CT: control target
= control target key end

     0   :  { %7 = vsyncpa [#allocation3], 0  ;;  %s1562_s0 = inlined_call_operand.hbm [shape: f32[2,8,32], index: 0, kind: input, shape index: {}]   ;;  %s1563_s1 = inlined_call_operand.hbm [shape: f32[2,16,32], index: 1, kind: input, shape index: {}]   ;;  %s1564_s2 = inlined_call_operand.hbm [shape: f32[2,11], index: 2, kind: output, shape index: {}]  }
   0x1   :  { %8 = vsyncpa [#allocation6], 0 }
   0x2   :  { %9 = vsyncpa [#allocation4], 0  ;;  %s1107_s9 = smov [#allocation2]   ;;  %s1035_s13 = scalar_lea.hbm %s1562_s0, 256 }
   0x3   :  { %s15_s10 = sshll.u32 %s1107_s9, 4  ;;  %p1036_p0 = scmp.ne.s32.totalorder %s1562_s0, %s1035_s13  ;;  %s16_s10 = int_to_ptr.vmem [resolvable:$true] %s15_s10 }
   0x4   :  { %p1039_p1 = scmp.lt.u32.totalorder %s1035_s13, %s1562_s0 }
   0x6   :  { %p1041_p2 = pnand %p1039_p1, %p1036_p0 }
   0x8   :  { %1044 = shalt.err (!%p1041_p2)
}
   0x9   :  { %s1045_s18 = scalar_lea.vmem %s16_s10, 256  ;;  %p1050_p4 = scmp.lt.s32.totalorder %s16_s10, %s16_s10 }
   0xa   :  { %p1046_p3 = scmp.ne.s32.totalorder %s16_s10, %s1045_s18  ;;  %p1051_p5 = scmp.lt.s32.totalorder %s1045_s18, %s1045_s18 }
   0xc   :  { %p1052_p6 = por %p1051_p5, %p1050_p4 }
   0xe   :  { %p1053_p7 = pnand %p1052_p6, %p1046_p3 }
  0x10   :  { %1056 = shalt.err (!%p1053_p7)
}
  0x11   :  { %s1108_s19 = smov 128   ;;  %s1109_s20 = smov 8  }
  0x12   :  { %21 = dma.hbm_to_vmem [thread:$0]  %s1562_s0, 256, %s16_s10, [#allocation3], %s1108_s19, %s1108_s19, %s1109_s20  }
  0x13   :  { %s1110_s23 = smov [#allocation5]   ;;  %s1057_s27 = scalar_lea.hbm %s1563_s1, 512 }
  0x14   :  { %s27_s24 = sshll.u32 %s1110_s23, 4  ;;  %p1058_p8 = scmp.ne.s32.totalorder %s1563_s1, %s1057_s27  ;;  %s28_s24 = int_to_ptr.vmem [resolvable:$true] %s27_s24 }
  0x15   :  { %p1061_p9 = scmp.lt.u32.totalorder %s1057_s27, %s1563_s1 }
  0x17   :  { %p1063_p10 = pnand %p1061_p9, %p1058_p8 }
  0x19   :  { %1066 = shalt.err (!%p1063_p10)
}
  0x1a   :  { %s1067_s4 = scalar_lea.vmem %s28_s24, 512  ;;  %p1072_p12 = scmp.lt.s32.totalorder %s28_s24, %s28_s24 }
  0x1b   :  { %p1068_p11 = scmp.ne.s32.totalorder %s28_s24, %s1067_s4  ;;  %p1073_p13 = scmp.lt.s32.totalorder %s1067_s4, %s1067_s4 }
  0x1d   :  { %p1074_p0 = por %p1073_p13, %p1072_p12 }
  0x1f   :  { %p1075_p1 = pnand %p1074_p0, %p1068_p11 }
  0x21   :  { %1078 = shalt.err (!%p1075_p1)
}
  0x22   :  { %33 = dma.hbm_to_vmem [thread:$0]  %s1563_s1, 512, %s28_s24, [#allocation6], %s1108_s19, %s1108_s19, %s1109_s20  }
  0x23   :  { %1101 = dma.done.wait [#allocation3], 256  }
  0x24   :  { %1102 = vsyncadd [#allocation3], 4294967040 }
  0x25   :  { %1103 = dma.done.wait [#allocation6], 512  }
  0x26   :  { %1104 = vsyncadd [#allocation6], 4294966784  ;;  %v1111_v0 = vmov 0.0|0.0   ;;  %vm1112_vm0 = vmmov 0   ;;  %v1113_v1 = vmov 0.0   ;;  %vm46_vm1 = vcmask 261120  }
  0x27   :  { %919 = vmatprep.subr.bf16.mxu0 %v1111_v0  ;;  %923 = vmatprep.subr.bf16.mxu1 %v1111_v0  ;;  %vm921_vm2 = vmpackc.low %vm46_vm1, %vm46_vm1  ;;  %v42_v2 = vld [vmem:[#allocation5] sm:$0xff]  ;;  %v43_v3 = vld [vmem:[#allocation5 + $0x8] sm:$0xff]  ;;  %v247_v32 = vlaneseq  ;;  %vm258_vm3 = vcmask 130112   ;;  %vm302_vm4 = vcmask 130048   ;;  %vm269_vm7 = vcmask 1041409   ;;  %s1114_s1 = smov [#allocation7]  }
  0x28   :  { %909 = vmatprep.mubr.msk.f32.mxu0 %vm1112_vm0, %v1113_v1  ;;  %916 = vmatprep.mubr.msk.f32.mxu1 %vm1112_vm0, %v1113_v1  ;;  %v44_v4 = vld [vmem:[#allocation5 + $0x10] sm:$0xff]  ;;  %v920_v5 = vpack.c.bf16 %v43_v3, %v42_v2  ;;  %v45_v6 = vld [vmem:[#allocation5 + $0x18] sm:$0xff]  ;;  %v217_v8 = vmul.f32 %v42_v2, %v42_v2  ;;  %v218_v11 = vmul.f32 %v43_v3, %v43_v3  ;;  %vm339_vm8 = vcmask 58368   ;;  %s861_s6 = sshll.u32 %s1114_s1, 4  ;;  %s862_s6 = int_to_ptr.vmem [resolvable:$true] %s861_s6 }
  0x29   :  { %v219_v7 = vmul.f32 %v44_v4, %v44_v4  ;;  %v924_v9 = vpack.c.bf16 %v45_v6, %v44_v4  ;;  %v220_v10 = vmul.f32 %v45_v6, %v45_v6  ;;  %v41_v14 = vld [vmem:[#allocation2 + $0x8] sm:$0xff]  ;;  %v40_v15 = vld [vmem:[#allocation2] sm:$0xff]  ;;  %v248_v35 = vand.u32 127, %v247_v32  ;;  %s1079_s7 = scalar_lea.vmem %s862_s6, 32  ;;  %p1084_p3 = scmp.lt.s32.totalorder %s862_s6, %s862_s6 }
  0x2a   :  { %922 = vmatpush3.bf16.xpose.msk.msra.mxu0 %vm921_vm2, %v920_v5  ;;  %v221_v13 = vsel %vm46_vm1, %v217_v8, 0.0  ;;  %v206_v17 = vmul.f32 %v41_v14, %v41_v14  ;;  %v224_v18 = vsel %vm46_vm1, %v218_v11, 0.0  ;;  %v205_v19 = vmul.f32 %v40_v15, %v40_v15  ;;  %p1080_p2 = scmp.ne.s32.totalorder %s862_s6, %s1079_s7  ;;  %p1085_p4 = scmp.lt.s32.totalorder %s1079_s7, %s1079_s7 }
  0x2b   :  { %v227_v12 = vsel %vm46_vm1, %v219_v7, 0.0  ;;  %926 = vmatpush3.bf16.xpose.msk.msra.mxu1 %vm921_vm2, %v924_v9  ;;  %222 = vadd.xlane.f32.xlu0 %v221_v13  ;;  %v230_v16 = vsel %vm46_vm1, %v220_v10, 0.0  ;;  %v250_v36 = vshrl.u32 %v247_v32, 7  ;;  %v253_v37 = vadd.s32 4294967288, %v248_v35 }
  0x2c   :  { %228 = vadd.xlane.f32.xlu1 %v227_v12  ;;  %v210_v20 = vsel %vm46_vm1, %v206_v17, 0.0  ;;  %v207_v21 = vsel %vm46_vm1, %v205_v19, 0.0  ;;  %p1086_p5 = por %p1085_p4, %p1084_p3 }
  0x2d   :  { %v1164_v40 = vsub.s32 %v248_v35, %v250_v36  ;;  %v256_v41 = vsub.s32 %v253_v37, %v250_v36 }
  0x2e   :  { %p1087_p6 = pnand %p1086_p5, %p1080_p2 }
  0x2f   :  { %225 = vadd.xlane.f32.xlu0 %v224_v18 }
  0x30   :  { %231 = vadd.xlane.f32.xlu1 %v230_v16 }
  0x31   :  { %910 = vmatmul.mubr.msk.f32.vlgmr.msra.gmra.mrb[0].mxu0 %vm46_vm1, %v40_v15 }
  0x32   :  { %917 = vmatmul.mubr.msk.f32.vlgmr.msra.gmra.mrb[0].mxu1 %vm46_vm1, %v41_v14 }
  0x33   :  { %208 = vadd.xlane.f32.xlu0 %v207_v21 }
  0x34   :  { %211 = vadd.xlane.f32.xlu1 %v210_v20 }
  0xb8   :  { %v223_v22 = vpop.xlane.xlu0 %222 }
  0xb9   :  { %v229_v23 = vpop.xlane.xlu1 %228  ;;  %v233_v27 = vmax.f32 %v223_v22, 1e-24 }
  0xba   :  { %v235_v26 = vmax.f32 %v229_v23, 1e-24 }
  0xbc   :  { %v226_v24 = vpop.xlane.xlu0 %225  ;;  %935 = vrsqrt.f32 %v235_v26 }
  0xbd   :  { %v232_v25 = vpop.xlane.xlu1 %231  ;;  %v234_v28 = vmax.f32 %v226_v24, 1e-24  ;;  %937 = vrsqrt.f32 %v233_v27 }
  0xbe   :  { %v236_v30 = vmax.f32 %v232_v25, 1e-24 }
  0xbf   :  { %939 = vrsqrt.f32 %v234_v28 }
  0xc0   :  { %v209_v29 = vpop.xlane.xlu0 %208  ;;  %941 = vrsqrt.f32 %v236_v30 }
  0xc1   :  { %v212_v31 = vpop.xlane.xlu1 %211  ;;  %v213_v33 = vmax.f32 %v209_v29, 1e-24 }
  0xc2   :  { %v214_v34 = vmax.f32 %v212_v31, 1e-24 }
  0xc3   :  { %943 = vrsqrt.f32 %v213_v33 }
  0xc4   :  { %945 = vrsqrt.f32 %v214_v34 }
  0xc6   :  { %v936_v38 = vpop.eup %935 }
  0xc7   :  { %v938_v39 = vpop.eup %937  ;;  %v263_v48 = vrot.slane %v936_v38, %v1164_v40 }
  0xc8   :  { %v252_v45 = vrot.slane %v938_v39, %v1164_v40 }
  0xc9   :  { %v940_v42 = vpop.eup %939 }
  0xca   :  { %v942_v43 = vpop.eup %941  ;;  %v257_v46 = vrot.slane %v940_v42, %v256_v41 }
  0xcb   :  { %v267_v49 = vrot.slane %v942_v43, %v256_v41 }
  0xcc   :  { %v259_v54 = vsel %vm258_vm3, %v257_v46, %v252_v45 }
  0xcd   :  { %v944_v44 = vpop.eup %943  ;;  %v268_v58 = vsel %vm258_vm3, %v267_v49, %v263_v48 }
  0xce   :  { %v946_v47 = vpop.eup %945 }
 0x104   :  { %v122_v50 = vpop.f32.mrb[0].mxu0 }
 0x105   :  { %v241_v51 = vmul.f32 %v944_v44, %v122_v50  ;;  %v201_v52 = vpop.f32.mrb[0].mxu1  ;;  %v911_v53 = vpop.f32.mrb[1].mxu0 }
 0x106   :  { %v242_v55 = vmul.f32 %v946_v47, %v201_v52  ;;  %v918_v56 = vpop.f32.mrb[1].mxu1 }
 0x107   :  { %v1168_v57 = vmul.f32 %v259_v54, %v241_v51 }
 0x108   :  { %v1170_v59 = vmul.f32 %v268_v58, %v242_v55 }
 0x109   :  { %v877_v60 = vadd.f32 0.9, %v1168_v57  ;;  %v879_v61 = vadd.f32 0.7, %v1168_v57  ;;  %v881_v62 = vadd.f32 0.5, %v1168_v57  ;;  %v891_v43 = vadd.f32 -0.5, %v1168_v57 }
 0x10a   :  { %v878_v63 = vadd.f32 0.9, %v1170_v59  ;;  %v880_v0 = vadd.f32 0.7, %v1170_v59  ;;  %v882_v1 = vadd.f32 0.5, %v1170_v59  ;;  %v892_v42 = vadd.f32 -0.5, %v1170_v59 }
 0x10b   :  { %v294_v2 = vmul.f32 %v877_v60, %v877_v60  ;;  %v347_v3 = vmul.f32 %v879_v61, %v879_v61  ;;  %v398_v4 = vmul.f32 %v881_v62, %v881_v62  ;;  %v884_v5 = vadd.f32 0.3, %v1170_v59 }
 0x10c   :  { %v295_v6 = vmul.f32 %v878_v63, %v878_v63  ;;  %v348_v7 = vmul.f32 %v880_v0, %v880_v0  ;;  %v399_v8 = vmul.f32 %v882_v1, %v882_v1  ;;  %v883_v9 = vadd.f32 0.3, %v1168_v57 }
 0x10d   :  { %v296_v10 = vmul.f32 -50.0, %v294_v2  ;;  %v349_v11 = vmul.f32 -50.0, %v347_v3  ;;  %v400_v14 = vmul.f32 -50.0, %v398_v4  ;;  %v450_v18 = vmul.f32 %v884_v5, %v884_v5 }
 0x10e   :  { %v297_v12 = vmul.f32 -50.0, %v295_v6  ;;  %v350_v13 = vmul.f32 -50.0, %v348_v7  ;;  %v449_v15 = vmul.f32 %v883_v9, %v883_v9  ;;  %v401_v17 = vmul.f32 -50.0, %v399_v8 }
 0x10f   :  { %v298_v16 = vmul.f32 1.442695, %v296_v10  ;;  %v351_v21 = vmul.f32 1.442695, %v349_v11  ;;  %v886_v22 = vadd.f32 0.1, %v1170_v59  ;;  %v654_v56 = vmul.f32 %v892_v42, %v892_v42 }
 0x110   :  { %v300_v19 = vmul.f32 1.442695, %v297_v12  ;;  %v353_v20 = vmul.f32 1.442695, %v350_v13  ;;  %v402_v23 = vmul.f32 1.442695, %v400_v14  ;;  %v653_v58 = vmul.f32 %v891_v43, %v891_v43 }
 0x111   :  { %947 = vpow2.f32 %v298_v16  ;;  %v451_v24 = vmul.f32 -50.0, %v449_v15  ;;  %v885_v25 = vadd.f32 0.1, %v1168_v57  ;;  %v404_v26 = vmul.f32 1.442695, %v401_v17 }
 0x112   :  { %949 = vpow2.f32 %v300_v19  ;;  %v452_v27 = vmul.f32 -50.0, %v450_v18  ;;  %v887_v28 = vadd.f32 -0.1, %v1168_v57  ;;  %v501_v29 = vmul.f32 %v886_v22, %v886_v22 }
 0x113   :  { %951 = vpow2.f32 %v353_v20  ;;  %v500_v30 = vmul.f32 %v885_v25, %v885_v25  ;;  %v888_v31 = vadd.f32 -0.1, %v1170_v59  ;;  %v453_v32 = vmul.f32 1.442695, %v451_v24 }
 0x114   :  { %953 = vpow2.f32 %v351_v21  ;;  %v890_v33 = vadd.f32 -0.3, %v1170_v59  ;;  %v551_v35 = vmul.f32 %v887_v28, %v887_v28  ;;  %v889_v36 = vadd.f32 -0.3, %v1168_v57 }
 0x115   :  { %955 = vpow2.f32 %v402_v23  ;;  %v502_v34 = vmul.f32 -50.0, %v500_v30  ;;  %v455_v37 = vmul.f32 1.442695, %v452_v27  ;;  %v503_v38 = vmul.f32 -50.0, %v501_v29 }
 0x116   :  { %957 = vpow2.f32 %v404_v26  ;;  %v552_v39 = vmul.f32 %v888_v31, %v888_v31  ;;  %v603_v41 = vmul.f32 %v890_v33, %v890_v33  ;;  %v553_v46 = vmul.f32 -50.0, %v551_v35 }
 0x117   :  { %959 = vpow2.f32 %v453_v32  ;;  %v504_v45 = vmul.f32 1.442695, %v502_v34  ;;  %v602_v47 = vmul.f32 %v889_v36, %v889_v36  ;;  %v506_v50 = vmul.f32 1.442695, %v503_v38 }
 0x118   :  { %961 = vpow2.f32 %v455_v37  ;;  %v554_v51 = vmul.f32 -50.0, %v552_v39  ;;  %v605_v55 = vmul.f32 -50.0, %v603_v41  ;;  %v555_v60 = vmul.f32 1.442695, %v553_v46 }
 0x119   :  { %963 = vpow2.f32 %v504_v45  ;;  %v604_v61 = vmul.f32 -50.0, %v602_v47  ;;  %v893_v62 = vadd.f32 -0.7, %v1168_v57  ;;  %v894_v1 = vadd.f32 -0.7, %v1170_v59 }
 0x11a   :  { %965 = vpow2.f32 %v506_v50  ;;  %v557_v0 = vmul.f32 1.442695, %v554_v51  ;;  %v608_v5 = vmul.f32 1.442695, %v605_v55  ;;  %v656_v6 = vmul.f32 -50.0, %v654_v56 }
 0x11b   :  { %v948_v44 = vpop.eup %947  ;;  %v655_v7 = vmul.f32 -50.0, %v653_v58  ;;  %967 = vpow2.f32 %v555_v60  ;;  %v606_v8 = vmul.f32 1.442695, %v604_v61  ;;  %v704_v9 = vmul.f32 %v893_v62, %v893_v62 }
 0x11c   :  { %v950_v48 = vpop.eup %949  ;;  %v303_v49 = vsel %vm302_vm4, %v948_v44, 0.0  ;;  %v895_v10 = vadd.f32 -0.9, %v1168_v57  ;;  %969 = vpow2.f32 %v557_v0  ;;  %v705_v12 = vmul.f32 %v894_v1, %v894_v1 }
 0x11d   :  { %v952_v52 = vpop.eup %951  ;;  %v306_v53 = vsel %vm302_vm4, %v950_v48, 0.0  ;;  %304 = vadd.xlane.f32.xlu0 %v303_v49  ;;  %v896_v13 = vadd.f32 -0.9, %v1170_v59  ;;  %971 = vpow2.f32 %v608_v5  ;;  %v659_v17 = vmul.f32 1.442695, %v656_v6 }
 0x11e   :  { %v954_v54 = vpop.eup %953  ;;  %307 = vadd.xlane.f32.xlu1 %v306_v53  ;;  %v358_v3 = vsel %vm302_vm4, %v952_v52, 0.0  ;;  %v657_v18 = vmul.f32 1.442695, %v655_v7  ;;  %973 = vpow2.f32 %v606_v8  ;;  %v706_v19 = vmul.f32 -50.0, %v704_v9 }
 0x11f   :  { %v355_v63 = vsel %vm302_vm4, %v954_v54, 0.0  ;;  %v956_v2 = vpop.eup %955  ;;  %v755_v20 = vmul.f32 %v895_v10, %v895_v10  ;;  %v897_v21 = vadd.f32 -1.0, %v1168_v57  ;;  %v707_v23 = vmul.f32 -50.0, %v705_v12 }
 0x120   :  { %v958_v4 = vpop.eup %957  ;;  %v406_v11 = vsel %vm302_vm4, %v956_v2, 0.0  ;;  %v756_v24 = vmul.f32 %v896_v13, %v896_v13  ;;  %v898_v25 = vadd.f32 -1.0, %v1170_v59  ;;  %975 = vpow2.f32 %v659_v17 }
 0x121   :  { %356 = vadd.xlane.f32.xlu0 %v355_v63  ;;  %v960_v14 = vpop.eup %959  ;;  %v409_v15 = vsel %vm302_vm4, %v958_v4, 0.0  ;;  %977 = vpow2.f32 %v657_v18  ;;  %v708_v29 = vmul.f32 1.442695, %v706_v19  ;;  %v757_v30 = vmul.f32 -50.0, %v755_v20 }
 0x122   :  { %359 = vadd.xlane.f32.xlu1 %v358_v3  ;;  %v962_v16 = vpop.eup %961  ;;  %v457_v22 = vsel %vm302_vm4, %v960_v14, 0.0  ;;  %v806_v31 = vmul.f32 %v897_v21, %v897_v21  ;;  %v710_v57 = vmul.f32 1.442695, %v707_v23  ;;  %v758_v33 = vmul.f32 -50.0, %v756_v24 }
 0x123   :  { %v964_v26 = vpop.eup %963  ;;  %v460_v27 = vsel %vm302_vm4, %v962_v16, 0.0  ;;  %v807_v34 = vmul.f32 %v898_v25, %v898_v25  ;;  %979 = vpow2.f32 %v708_v29  ;;  %v759_v37 = vmul.f32 1.442695, %v757_v30 }
 0x124   :  { %v966_v28 = vpop.eup %965  ;;  %v508_v32 = vsel %vm302_vm4, %v964_v26, 0.0  ;;  %v808_v38 = vmul.f32 -500000.0, %v806_v31  ;;  %981 = vpow2.f32 %v710_v57  ;;  %v761_v42 = vmul.f32 1.442695, %v758_v33 }
 0x125   :  { %407 = vadd.xlane.f32.xlu0 %v406_v11  ;;  %v968_v35 = vpop.eup %967  ;;  %v511_v36 = vsel %vm302_vm4, %v966_v28, 0.0  ;;  %v809_v43 = vmul.f32 -500000.0, %v807_v34  ;;  %983 = vpow2.f32 %v759_v37 }
 0x126   :  { %410 = vadd.xlane.f32.xlu1 %v409_v15  ;;  %v970_v59 = vpop.eup %969  ;;  %v559_v41 = vsel %vm302_vm4, %v968_v35, 0.0  ;;  %v810_v46 = vmul.f32 1.442695, %v808_v38  ;;  %985 = vpow2.f32 %v761_v42 }
 0x127   :  { %v972_v39 = vpop.eup %971  ;;  %v562_v45 = vsel %vm302_vm4, %v970_v59, 0.0  ;;  %v812_v49 = vmul.f32 1.442695, %v809_v43 }
 0x128   :  { %v974_v44 = vpop.eup %973  ;;  %v613_v51 = vsel %vm302_vm4, %v972_v39, 0.0  ;;  %987 = vpow2.f32 %v810_v46 }
 0x129   :  { %458 = vadd.xlane.f32.xlu0 %v457_v22  ;;  %v610_v48 = vsel %vm302_vm4, %v974_v44, 0.0  ;;  %989 = vpow2.f32 %v812_v49 }
 0x12a   :  { %461 = vadd.xlane.f32.xlu1 %v460_v27  ;;  %v976_v47 = vpop.eup %975 }
 0x12b   :  { %v978_v50 = vpop.eup %977  ;;  %v664_v54 = vsel %vm302_vm4, %v976_v47, 0.0 }
 0x12c   :  { %v661_v52 = vsel %vm302_vm4, %v978_v50, 0.0 }
 0x12d   :  { %509 = vadd.xlane.f32.xlu0 %v508_v32  ;;  %v980_v53 = vpop.eup %979 }
 0x12e   :  { %512 = vadd.xlane.f32.xlu1 %v511_v36  ;;  %v982_v55 = vpop.eup %981  ;;  %v712_v56 = vsel %vm302_vm4, %v980_v53, 0.0 }
 0x12f   :  { %v984_v58 = vpop.eup %983  ;;  %v715_v60 = vsel %vm302_vm4, %v982_v55, 0.0 }
 0x130   :  { %v986_v61 = vpop.eup %985  ;;  %v763_v62 = vsel %vm302_vm4, %v984_v58, 0.0 }
 0x131   :  { %560 = vadd.xlane.f32.xlu0 %v559_v41  ;;  %v766_v0 = vsel %vm302_vm4, %v986_v61, 0.0 }
 0x132   :  { %563 = vadd.xlane.f32.xlu1 %v562_v45  ;;  %v988_v63 = vpop.eup %987 }
 0x133   :  { %v990_v1 = vpop.eup %989  ;;  %v814_v2 = vsel %vm302_vm4, %v988_v63, 0.0 }
 0x134   :  { %v817_v3 = vsel %vm302_vm4, %v990_v1, 0.0 }
 0x135   :  { %611 = vadd.xlane.f32.xlu0 %v610_v48 }
 0x136   :  { %614 = vadd.xlane.f32.xlu1 %v613_v51 }
 0x139   :  { %662 = vadd.xlane.f32.xlu0 %v661_v52 }
 0x13a   :  { %665 = vadd.xlane.f32.xlu1 %v664_v54 }
 0x13d   :  { %713 = vadd.xlane.f32.xlu0 %v712_v56 }
 0x13e   :  { %716 = vadd.xlane.f32.xlu1 %v715_v60 }
 0x141   :  { %764 = vadd.xlane.f32.xlu0 %v763_v62 }
 0x142   :  { %767 = vadd.xlane.f32.xlu1 %v766_v0 }
 0x145   :  { %815 = vadd.xlane.f32.xlu0 %v814_v2 }
 0x146   :  { %818 = vadd.xlane.f32.xlu1 %v817_v3 }
 0x1aa   :  { %v305_v4 = vpop.xlane.xlu0 %304 }
 0x1ab   :  { %v308_v5 = vpop.xlane.xlu1 %307  ;;  %v309_v6 = vadd.f32 1.0, %v305_v4  ;;  %v312_v10 = vmul.f32 -0.5, %v305_v4  ;;  %v315_v15 = vand.u32 2147483647, %v305_v4 }
 0x1ac   :  { %v318_v7 = vadd.f32 1.0, %v308_v5  ;;  %v321_v11 = vmul.f32 -0.5, %v308_v5  ;;  %v324_v18 = vand.u32 2147483647, %v308_v5 }
 0x1ad   :  { %991 = vlog2.f32 %v309_v6  ;;  %v313_v19 = vadd.f32 1.0, %v312_v10  ;;  %vm1225_vm5 = vcmp.lt.f32.partialorder %v315_v15, 0.0004427343 }
 0x1ae   :  { %v357_v8 = vpop.xlane.xlu0 %356  ;;  %993 = vlog2.f32 %v318_v7  ;;  %v322_v20 = vadd.f32 1.0, %v321_v11  ;;  %vm1232_vm6 = vcmp.lt.f32.partialorder %v324_v18, 0.0004427343 }
 0x1af   :  { %v360_v9 = vpop.xlane.xlu1 %359  ;;  %v361_v12 = vadd.f32 1.0, %v357_v8  ;;  %v364_v22 = vmul.f32 -0.5, %v357_v8  ;;  %v314_v31 = vmul.f32 %v313_v19, %v305_v4  ;;  %v367_v32 = vand.u32 2147483647, %v357_v8 }
 0x1b0   :  { %v370_v13 = vadd.f32 1.0, %v360_v9  ;;  %v373_v21 = vmul.f32 -0.5, %v360_v9  ;;  %v323_v34 = vmul.f32 %v322_v20, %v308_v5  ;;  %v376_v43 = vand.u32 2147483647, %v360_v9 }
 0x1b1   :  { %995 = vlog2.f32 %v361_v12  ;;  %v365_v36 = vadd.f32 1.0, %v364_v22  ;;  %vm1252_vm9 = vcmp.lt.f32.partialorder %v367_v32, 0.0004427343 }
 0x1b2   :  { %v1216_v14 = vpop.xlane.xlu0 %407  ;;  %997 = vlog2.f32 %v370_v13  ;;  %v374_v35 = vadd.f32 1.0, %v373_v21  ;;  %vm1262_vm10 = vcmp.lt.f32.partialorder %v376_v43, 0.0004427343 }
 0x1b3   :  { %v1218_v16 = vpop.xlane.xlu1 %410  ;;  %v412_v17 = vadd.f32 1.0, %v1216_v14  ;;  %v415_v24 = vmul.f32 -0.5, %v1216_v14  ;;  %v1249_v51 = vmul.f32 %v365_v36, %v357_v8  ;;  %v418_v52 = vand.u32 2147483647, %v1216_v14 }
 0x1b4   :  { %v421_v23 = vadd.f32 1.0, %v1218_v16  ;;  %v424_v27 = vmul.f32 -0.5, %v1218_v16  ;;  %v1247_v50 = vmul.f32 %v374_v35, %v360_v9  ;;  %v427_v55 = vand.u32 2147483647, %v1218_v16 }
 0x1b5   :  { %999 = vlog2.f32 %v412_v17  ;;  %v416_v37 = vadd.f32 1.0, %v415_v24  ;;  %vm1299_vm11 = vcmp.lt.f32.partialorder %v418_v52, 0.0004427343 }
 0x1b6   :  { %v1223_v25 = vpop.xlane.xlu0 %458  ;;  %1001 = vlog2.f32 %v421_v23  ;;  %v425_v44 = vadd.f32 1.0, %v424_v27  ;;  %vm1305_vm12 = vcmp.lt.f32.partialorder %v427_v55, 0.0004427343 }
 0x1b7   :  { %v1230_v28 = vpop.xlane.xlu1 %461  ;;  %v992_v29 = vpop.eup %991  ;;  %v463_v57 = vadd.f32 1.0, %v1223_v25  ;;  %v466_v59 = vmul.f32 -0.5, %v1223_v25  ;;  %v1258_v56 = vmul.f32 %v416_v37, %v1216_v14  ;;  %v469_v63 = vand.u32 2147483647, %v1223_v25 }
 0x1b8   :  { %v994_v33 = vpop.eup %993  ;;  %v472_v38 = vadd.f32 1.0, %v1230_v28  ;;  %v475_v39 = vmul.f32 -0.5, %v1230_v28  ;;  %v311_v42 = vmul.f32 0.6931472, %v992_v29  ;;  %v1273_v4 = vmul.f32 %v425_v44, %v1218_v16 }
 0x1b9   :  { %v320_v47 = vmul.f32 0.6931472, %v994_v33  ;;  %1003 = vlog2.f32 %v463_v57  ;;  %v467_v53 = vadd.f32 1.0, %v466_v59  ;;  %v478_v8 = vand.u32 2147483647, %v1230_v28 }
 0x1ba   :  { %v1240_v41 = vpop.xlane.xlu0 %509  ;;  %1005 = vlog2.f32 %v472_v38  ;;  %v476_v58 = vadd.f32 1.0, %v475_v39  ;;  %v317_v2 = vsel %vm1225_vm5, %v314_v31, %v311_v42  ;;  %vm1342_vm14 = vcmp.lt.f32.partialorder %v469_v63, 0.0004427343 }
 0x1bb   :  { %v1242_v45 = vpop.xlane.xlu1 %512  ;;  %v514_v46 = vadd.f32 1.0, %v1240_v41  ;;  %v517_v49 = vmul.f32 -0.5, %v1240_v41  ;;  %v996_v61 = vpop.eup %995  ;;  %v326_v6 = vsel %vm1232_vm6, %v323_v34, %v320_v47  ;;  %v1279_v9 = vmul.f32 %v467_v53, %v1223_v25 }
 0x1bc   :  { %v523_v48 = vadd.f32 1.0, %v1242_v45  ;;  %v526_v0 = vmul.f32 -0.5, %v1242_v45  ;;  %v998_v3 = vpop.eup %997  ;;  %v363_v12 = vmul.f32 0.6931472, %v996_v61  ;;  %v1284_v13 = vmul.f32 %v476_v58, %v1230_v28 }
 0x1bd   :  { %1007 = vlog2.f32 %v514_v46  ;;  %v518_v5 = vadd.f32 1.0, %v517_v49  ;;  %v332_v15 = vrot.slane %v317_v2, %v1164_v40  ;;  %v372_v17 = vmul.f32 0.6931472, %v998_v3 }
 0x1be   :  { %v1260_v60 = vpop.xlane.xlu0 %560  ;;  %1009 = vlog2.f32 %v523_v48  ;;  %v527_v18 = vadd.f32 1.0, %v526_v0  ;;  %v336_v20 = vrot.slane %v326_v6, %v1164_v40  ;;  %v529_v24 = vand.u32 2147483647, %v1242_v45 }
 0x1bf   :  { %v1268_v1 = vpop.xlane.xlu1 %563  ;;  %v1000_v7 = vpop.eup %999  ;;  %v565_v10 = vadd.f32 1.0, %v1260_v60  ;;  %v568_v11 = vmul.f32 -0.5, %v1260_v60  ;;  %v1296_v26 = vmul.f32 %v518_v5, %v1240_v41  ;;  %v520_v27 = vand.u32 2147483647, %v1240_v41 }
 0x1c0   :  { %v574_v14 = vadd.f32 1.0, %v1268_v1  ;;  %v577_v19 = vmul.f32 -0.5, %v1268_v1  ;;  %v1002_v22 = vpop.eup %1001  ;;  %v414_v23 = vmul.f32 0.6931472, %v1000_v7  ;;  %v337_v30 = vsel %vm269_vm7, %v336_v20, %v332_v15 }
 0x1c1   :  { %1011 = vlog2.f32 %v565_v10  ;;  %v569_v29 = vadd.f32 1.0, %v568_v11  ;;  %v340_v33 = vsel %vm339_vm8, %v337_v30, 0.0  ;;  %v423_v59 = vmul.f32 0.6931472, %v1002_v22 }
 0x1c2   :  { %v1288_v16 = vpop.xlane.xlu0 %611  ;;  %1013 = vlog2.f32 %v574_v14  ;;  %v1315_v37 = vmul.f32 %v527_v18, %v1242_v45  ;;  %v578_v38 = vadd.f32 1.0, %v577_v19  ;;  %341 = vadd.xlane.f32.xlu0 %v340_v33  ;;  %v369_v39 = vsel %vm1252_vm9, %v1249_v51, %v363_v12 }
 0x1c3   :  { %v1292_v21 = vpop.xlane.xlu1 %614  ;;  %v1004_v32 = vpop.eup %1003  ;;  %v616_v35 = vadd.f32 1.0, %v1288_v16  ;;  %v580_v43 = vand.u32 2147483647, %v1268_v1  ;;  %v571_v44 = vand.u32 2147483647, %v1260_v60  ;;  %v619_v46 = vmul.f32 -0.5, %v1288_v16 }
 0x1c4   :  { %v625_v31 = vadd.f32 1.0, %v1292_v21  ;;  %v628_v34 = vmul.f32 -0.5, %v1292_v21  ;;  %v1006_v42 = vpop.eup %1005  ;;  %v378_v47 = vsel %vm1262_vm10, %v1247_v50, %v372_v17  ;;  %v1328_v49 = vmul.f32 0.6931472, %v1004_v32 }
 0x1c5   :  { %v1331_v52 = vmul.f32 %v569_v29, %v1260_v60  ;;  %v384_v51 = vrot.slane %v369_v39, %v1164_v40  ;;  %v388_v55 = vrot.slane %v378_v47, %v1164_v40  ;;  %v474_v61 = vmul.f32 0.6931472, %v1006_v42 }
 0x1c6   :  { %v1312_v36 = vpop.xlane.xlu0 %662  ;;  %1015 = vlog2.f32 %v625_v31  ;;  %v629_v54 = vadd.f32 1.0, %v628_v34  ;;  %vm1336_vm13 = vcmp.lt.f32.partialorder %v478_v8, 0.0004427343  ;;  %v1347_v0 = vmul.f32 %v578_v38, %v1268_v1 }
 0x1c7   :  { %v1320_v41 = vpop.xlane.xlu1 %665  ;;  %v1008_v48 = vpop.eup %1007  ;;  %1017 = vlog2.f32 %v616_v35  ;;  %v631_v2 = vand.u32 2147483647, %v1292_v21  ;;  %v667_v3 = vadd.f32 1.0, %v1312_v36  ;;  %v620_v6 = vadd.f32 1.0, %v619_v46 }
 0x1c8   :  { %v1010_v53 = vpop.eup %1009  ;;  %v676_v58 = vadd.f32 1.0, %v1320_v41  ;;  %v622_v7 = vand.u32 2147483647, %v1288_v16  ;;  %v389_v8 = vsel %vm269_vm7, %v388_v55, %v384_v51  ;;  %v1359_v10 = vmul.f32 0.6931472, %v1008_v48 }
 0x1c9   :  { %v1357_v63 = vmul.f32 0.6931472, %v1010_v53  ;;  %v391_v11 = vsel %vm339_vm8, %v389_v8, 0.0  ;;  %v679_v12 = vmul.f32 -0.5, %v1320_v41  ;;  %v1364_v14 = vmul.f32 %v629_v54, %v1292_v21 }
 0x1ca   :  { %1019 = vlog2.f32 %v676_v58  ;;  %v1355_v25 = vpop.xlane.xlu0 %713  ;;  %392 = vadd.xlane.f32.xlu1 %v391_v11  ;;  %v670_v15 = vmul.f32 -0.5, %v1312_v36  ;;  %v420_v17 = vsel %vm1299_vm11, %v1258_v56, %v414_v23  ;;  %v429_v19 = vsel %vm1305_vm12, %v1273_v4, %v423_v59 }
 0x1cb   :  { %v1351_v5 = vpop.xlane.xlu1 %716  ;;  %1021 = vlog2.f32 %v667_v3  ;;  %v1012_v18 = vpop.eup %1011  ;;  %v435_v20 = vrot.slane %v420_v17, %v1164_v40  ;;  %vm1376_vm15 = vcmp.lt.f32.partialorder %v520_v27, 0.0004427343  ;;  %v1381_v31 = vmul.f32 %v620_v6, %v1288_v16 }
 0x1cc   :  { %v727_v22 = vadd.f32 1.0, %v1351_v5  ;;  %v730_v21 = vmul.f32 -0.5, %v1351_v5  ;;  %v1014_v29 = vpop.eup %1013  ;;  %v682_v56 = vand.u32 2147483647, %v1320_v41  ;;  %v439_v23 = vrot.slane %v429_v19, %v1164_v40 }
 0x1cd   :  { %v718_v4 = vadd.f32 1.0, %v1355_v25  ;;  %vm1388_vm0 = vcmp.lt.f32.partialorder %v529_v24, 0.0004427343  ;;  %v680_v32 = vadd.f32 1.0, %v679_v12  ;;  %v673_v27 = vand.u32 2147483647, %v1312_v36 }
 0x1ce   :  { %1023 = vlog2.f32 %v727_v22  ;;  %v721_v57 = vmul.f32 -0.5, %v1355_v25  ;;  %v1396_v33 = vmul.f32 0.6931472, %v1012_v18  ;;  %v671_v34 = vadd.f32 1.0, %v670_v15  ;;  %v1399_v59 = vpop.xlane.xlu0 %764 }
 0x1cf   :  { %v1394_v16 = vpop.xlane.xlu1 %767  ;;  %v440_v35 = vsel %vm269_vm7, %v439_v23, %v435_v20  ;;  %1025 = vlog2.f32 %v718_v4  ;;  %v1401_v24 = vmul.f32 0.6931472, %v1014_v29  ;;  %v731_v39 = vadd.f32 1.0, %v730_v21 }
 0x1d0   :  { %v1016_v45 = vpop.eup %1015  ;;  %v442_v38 = vsel %vm339_vm8, %v440_v35, 0.0  ;;  %v722_v42 = vadd.f32 1.0, %v721_v57  ;;  %v471_v47 = vsel %vm1342_vm14, %v1279_v9, %v1328_v49  ;;  %v480_v48 = vsel %vm1336_vm13, %v1284_v13, %v474_v61 }
 0x1d1   :  { %v1018_v46 = vpop.eup %1017  ;;  %443 = vadd.xlane.f32.xlu0 %v442_v38  ;;  %v778_v51 = vadd.f32 1.0, %v1394_v16  ;;  %v781_v53 = vmul.f32 -0.5, %v1394_v16  ;;  %v1414_v54 = vmul.f32 %v680_v32, %v1320_v41  ;;  %v724_v55 = vand.u32 2147483647, %v1355_v25 }
 0x1d2   :  { %v486_v58 = vrot.slane %v471_v47, %v1164_v40  ;;  %v490_v3 = vrot.slane %v480_v48, %v1164_v40  ;;  %vm1421_vm1 = vcmp.lt.f32.partialorder %v580_v43, 0.0004427343  ;;  %vm1427_vm2 = vcmp.lt.f32.partialorder %v571_v44, 0.0004427343  ;;  %v1457_v17 = vpop.xlane.xlu0 %815 }
 0x1d3   :  { %vm1431_vm3 = vcmp.lt.f32.partialorder %v631_v2, 0.0004427343  ;;  %vm1435_vm4 = vcmp.lt.f32.partialorder %v622_v7, 0.0004427343  ;;  %v1440_v1 = vmul.f32 %v671_v34, %v1312_v36  ;;  %v733_v43 = vand.u32 2147483647, %v1351_v5  ;;  %v1446_v2 = vpop.xlane.xlu1 %818 }
 0x1d4   :  { %v1020_v6 = vpop.eup %1019  ;;  %1027 = vlog2.f32 %v778_v51  ;;  %v769_v60 = vadd.f32 1.0, %v1399_v59  ;;  %v627_v44 = vmul.f32 0.6931472, %v1016_v45  ;;  %v618_v61 = vmul.f32 0.6931472, %v1018_v46 }
 0x1d5   :  { %v491_v62 = vsel %vm269_vm7, %v490_v3, %v486_v58  ;;  %v772_v50 = vmul.f32 -0.5, %v1399_v59  ;;  %v1022_v7 = vpop.eup %1021  ;;  %vm1448_vm5 = vcmp.lt.f32.partialorder %v673_v27, 0.0004427343  ;;  %v1453_v36 = vmul.f32 %v731_v39, %v1351_v5 }
 0x1d6   :  { %v723_v11 = vmul.f32 %v722_v42, %v1355_v25  ;;  %v493_v12 = vsel %vm339_vm8, %v491_v62, 0.0  ;;  %v782_v15 = vadd.f32 1.0, %v781_v53  ;;  %v678_v18 = vmul.f32 0.6931472, %v1020_v6 }
 0x1d7   :  { %vm1459_vm6 = vcmp.lt.f32.partialorder %v682_v56, 0.0004427343  ;;  %vm1463_vm9 = vcmp.lt.f32.partialorder %v724_v55, 0.0004427343  ;;  %494 = vadd.xlane.f32.xlu1 %v493_v12  ;;  %v784_v5 = vand.u32 2147483647, %v1394_v16  ;;  %1029 = vlog2.f32 %v769_v60 }
 0x1d8   :  { %v522_v25 = vsel %vm1376_vm15, %v1296_v26, %v1359_v10  ;;  %vm1472_vm10 = vcmp.lt.f32.partialorder %v733_v43, 0.0004427343  ;;  %v773_v21 = vadd.f32 1.0, %v772_v50  ;;  %v531_v29 = vsel %vm1388_vm0, %v1315_v37, %v1357_v63  ;;  %v1024_v4 = vpop.eup %1023 }
 0x1d9   :  { %v537_v56 = vrot.slane %v522_v25, %v1164_v40  ;;  %v829_v23 = vadd.f32 1.0, %v1446_v2  ;;  %v669_v32 = vmul.f32 0.6931472, %v1022_v7  ;;  %v775_v27 = vand.u32 2147483647, %v1399_v59  ;;  %v1026_v30 = vpop.eup %1025 }
 0x1da   :  { %v541_v26 = vrot.slane %v531_v29, %v1164_v40  ;;  %v820_v10 = vadd.f32 1.0, %v1457_v17  ;;  %v783_v57 = vmul.f32 %v782_v15, %v1394_v16  ;;  %v832_v34 = vmul.f32 -0.5, %v1446_v2 }
 0x1db   :  { %1031 = vlog2.f32 %v829_v23  ;;  %v823_v37 = vmul.f32 -0.5, %v1457_v17  ;;  %vm1488_vm11 = vcmp.lt.f32.partialorder %v784_v5, 0.0004427343  ;;  %v835_v35 = vand.u32 2147483647, %v1446_v2 }
 0x1dc   :  { %v542_v28 = vsel %vm269_vm7, %v541_v26, %v537_v56  ;;  %1033 = vlog2.f32 %v820_v10  ;;  %v729_v45 = vmul.f32 0.6931472, %v1024_v4  ;;  %v720_v38 = vmul.f32 0.6931472, %v1026_v30 }
 0x1dd   :  { %v774_v39 = vmul.f32 %v773_v21, %v1399_v59  ;;  %v544_v16 = vsel %vm339_vm8, %v542_v28, 0.0  ;;  %v573_v42 = vsel %vm1427_vm2, %v1331_v52, %v1396_v33  ;;  %v582_v46 = vsel %vm1421_vm1, %v1347_v0, %v1401_v24 }
 0x1de   :  { %545 = vadd.xlane.f32.xlu0 %v544_v16  ;;  %v624_v47 = vsel %vm1435_vm4, %v1381_v31, %v618_v61  ;;  %v633_v59 = vsel %vm1431_vm3, %v1364_v14, %v627_v44  ;;  %v1028_v48 = vpop.eup %1027  ;;  %v833_v51 = vadd.f32 1.0, %v832_v34  ;;  %v824_v53 = vadd.f32 1.0, %v823_v37 }
 0x1df   :  { %v588_v55 = vrot.slane %v573_v42, %v1164_v40  ;;  %v592_v52 = vrot.slane %v582_v46, %v1164_v40  ;;  %v780_v33 = vmul.f32 0.6931472, %v1028_v48  ;;  %v639_v58 = vrot.slane %v624_v47, %v1164_v40 }
 0x1e0   :  { %v643_v0 = vrot.slane %v633_v59, %v1164_v40  ;;  %v675_v31 = vsel %vm1448_vm5, %v1440_v1, %v669_v32  ;;  %v684_v14 = vsel %vm1459_vm6, %v1414_v54, %v678_v18  ;;  %v726_v6 = vsel %vm1463_vm9, %v723_v11, %v720_v38 }
 0x1e1   :  { %v593_v24 = vsel %vm269_vm7, %v592_v52, %v588_v55  ;;  %v690_v3 = vrot.slane %v675_v31, %v1164_v40  ;;  %v1030_v9 = vpop.eup %1029  ;;  %v694_v49 = vrot.slane %v684_v14, %v1164_v40  ;;  %v735_v1 = vsel %vm1472_vm10, %v1453_v36, %v729_v45 }
 0x1e2   :  { %v595_v13 = vsel %vm339_vm8, %v593_v24, 0.0  ;;  %v644_v41 = vsel %vm269_vm7, %v643_v0, %v639_v58  ;;  %v771_v43 = vmul.f32 0.6931472, %v1030_v9  ;;  %v741_v60 = vrot.slane %v726_v6, %v1164_v40 }
 0x1e3   :  { %596 = vadd.xlane.f32.xlu1 %v595_v13  ;;  %v646_v54 = vsel %vm339_vm8, %v644_v41, 0.0  ;;  %v745_v44 = vrot.slane %v735_v1, %v1164_v40  ;;  %vm776_vm12 = vcmp.lt.f32.partialorder %v775_v27, 0.0004427343  ;;  %v826_v61 = vand.u32 2147483647, %v1457_v17 }
 0x1e4   :  { %647 = vadd.xlane.f32.xlu0 %v646_v54  ;;  %v695_v62 = vsel %vm269_vm7, %v694_v49, %v690_v3  ;;  %v786_v50 = vsel %vm1488_vm11, %v783_v57, %v780_v33  ;;  %v777_v11 = vsel %vm776_vm12, %v774_v39, %v771_v43  ;;  %v834_v19 = vmul.f32 %v833_v51, %v1446_v2 }
 0x1e5   :  { %v1032_v7 = vpop.eup %1031  ;;  %v697_v8 = vsel %vm339_vm8, %v695_v62, 0.0  ;;  %v746_v36 = vsel %vm269_vm7, %v745_v44, %v741_v60  ;;  %v796_v12 = vrot.slane %v786_v50, %v1164_v40  ;;  %v792_v5 = vrot.slane %v777_v11, %v1164_v40 }
 0x1e6   :  { %v1034_v15 = vpop.eup %1033  ;;  %v831_v18 = vmul.f32 0.6931472, %v1032_v7  ;;  %v748_v20 = vsel %vm339_vm8, %v746_v36, 0.0  ;;  %vm836_vm13 = vcmp.lt.f32.partialorder %v835_v35, 0.0004427343  ;;  %v825_v22 = vmul.f32 %v824_v53, %v1457_v17 }
 0x1e7   :  { %v822_v25 = vmul.f32 0.6931472, %v1034_v15  ;;  %698 = vadd.xlane.f32.xlu1 %v697_v8  ;;  %vm827_vm14 = vcmp.lt.f32.partialorder %v826_v61, 0.0004427343  ;;  %v797_v21 = vsel %vm269_vm7, %v796_v12, %v792_v5  ;;  %vm343_vm15 = vcmask 1024  }
 0x1e8   :  { %749 = vadd.xlane.f32.xlu0 %v748_v20  ;;  %v837_v29 = vsel %vm836_vm13, %v834_v19, %v831_v18  ;;  %v799_v56 = vsel %vm339_vm8, %v797_v21, 0.0  ;;  %vm394_vm0 = vcmask 9224   ;;  %vm445_vm1 = vcmask 17424  }
 0x1e9   :  { %v828_v23 = vsel %vm827_vm14, %v825_v22, %v822_v25  ;;  %v847_v4 = vrot.slane %v837_v29, %v1164_v40  ;;  %vm496_vm2 = vcmask 25624   ;;  %vm547_vm3 = vcmask 33824  }
 0x1ea   :  { %v843_v2 = vrot.slane %v828_v23, %v1164_v40  ;;  %vm598_vm4 = vcmask 42024   ;;  %vm751_vm5 = vcmask 66624   ;;  %vm802_vm6 = vcmask 74824  }
 0x1eb   :  { %800 = vadd.xlane.f32.xlu1 %v799_v56  ;;  %vm853_vm9 = vcmask 83024  }
 0x1ec   :  { %v848_v32 = vsel %vm269_vm7, %v847_v4, %v843_v2  ;;  %vm649_vm7 = vcmask 50224  }
 0x1ed   :  { %v850_v27 = vsel %vm339_vm8, %v848_v32, 0.0  ;;  %vm700_vm8 = vcmask 58424  }
 0x1ee   :  { %851 = vadd.xlane.f32.xlu0 %v850_v27 }
 0x24f   :  { %v342_v17 = vpop.xlane.xlu0 %341 }
 0x250   :  { %344 = vst.msk [vmem:[#allocation7] sm:$0x3] %vm343_vm15, %v342_v17 }
 0x257   :  { %v393_v26 = vpop.xlane.xlu1 %392 }
 0x258   :  { %395 = vst.msk [vmem:[#allocation7] sm:$0x3] %vm394_vm0, %v393_v26 }
 0x25e   :  { %v444_v10 = vpop.xlane.xlu0 %443 }
 0x25f   :  { %446 = vst.msk [vmem:[#allocation7] sm:$0x3] %vm445_vm1, %v444_v10 }
 0x264   :  { %v495_v30 = vpop.xlane.xlu1 %494 }
 0x265   :  { %497 = vst.msk [vmem:[#allocation7] sm:$0x3] %vm496_vm2, %v495_v30 }
 0x26b   :  { %v546_v40 = vpop.xlane.xlu0 %545 }
 0x26c   :  { %548 = vst.msk [vmem:[#allocation7] sm:$0x3] %vm547_vm3, %v546_v40 }
 0x270   :  { %v597_v57 = vpop.xlane.xlu1 %596 }
 0x271   :  { %599 = vst.msk [vmem:[#allocation7] sm:$0x3] %vm598_vm4, %v597_v57  ;;  %v648_v34 = vpop.xlane.xlu0 %647 }
 0x272   :  { %650 = vst.msk [vmem:[#allocation7] sm:$0x3] %vm649_vm7, %v648_v34 }
 0x274   :  { %v699_v37 = vpop.xlane.xlu1 %698 }
 0x275   :  { %701 = vst.msk [vmem:[#allocation7] sm:$0x3] %vm700_vm8, %v699_v37  ;;  %v750_v63 = vpop.xlane.xlu0 %749 }
 0x276   :  { %752 = vst.msk [vmem:[#allocation7] sm:$0x3] %vm751_vm5, %v750_v63 }
 0x278   :  { %v801_v28 = vpop.xlane.xlu1 %800 }
 0x279   :  { %803 = vst.msk [vmem:[#allocation7] sm:$0x3] %vm802_vm6, %v801_v28 }
 0x27b   :  { %v852_v35 = vpop.xlane.xlu0 %851 }
 0x27c   :  { %854 = vst.msk [vmem:[#allocation7] sm:$0x3] %vm853_vm9, %v852_v35 }
 0x27d   :  { %1090 = shalt.err (!%p1087_p6)
}
 0x27e   :  { %s1091_s10 = scalar_lea.hbm %s1564_s2, 32 }
 0x27f   :  { %p1092_p7 = scmp.ne.s32.totalorder %s1564_s2, %s1091_s10  ;;  %p1095_p8 = scmp.lt.u32.totalorder %s1091_s10, %s1564_s2 }
 0x281   :  { %p1097_p9 = pnand %p1095_p8, %p1092_p7 }
 0x283   :  { %1100 = shalt.err (!%p1097_p9)
}
 0x284   :  { %864 = dma.vmem_to_hbm [thread:$0]  %s862_s6, 32, %s1564_s2, [#allocation4]  }
 0x285   :  { %1105 = dma.done.wait [#allocation4], 32  }
 0x286   :  { %1106 = vsyncadd [#allocation4], 4294967264 }
 0x287   :  { %868 = vsyncpa [#allocation3], 1 }
 0x288   :  { %869 = vsyncpa [#allocation6], 1 }
 0x289   :  { %870 = vsyncpa [#allocation4], 1 }

</bundles_post_ra>
